<compile_context>
chip_gen: v7x
topology: tpu7x:2x2x1
jax: 0.10.0
libtpu: 0.0.40
codegen_flags: <defaults>
</compile_context>

<pallas_src>
import functools
import math

import jax
import jax.numpy as jnp
import numpy as np
from jax.experimental import pallas as pl
from jax.experimental.pallas import tpu as pltpu


# ----------------------------------------------------------------------------
# Fused kernel: accumulate G1 = x1 x1^T and G2 = x2 x2^T over feature chunks,
# then finalize (norms from Gram diagonals, scale, reduce, divide) on the last
# grid step.
# ----------------------------------------------------------------------------
def _diff_loss_kernel(x1_ref, x2_ref, out_ref, g1_ref, g2_ref, *, d1, d2):
    k = pl.program_id(0)

    @pl.when(k == 0)
    def _():
        g1_ref[...] = jnp.zeros_like(g1_ref)
        g2_ref[...] = jnp.zeros_like(g2_ref)

    x1 = x1_ref[...]                       # (B, td1), native dtype
    x2 = x2_ref[...]                       # (B, td2)

    # Contraction over the feature axis (the large dim) -> MXU-shaped K,
    # f32 accumulation regardless of input dtype.
    g1_ref[...] += jax.lax.dot_general(
        x1, x1, (((1,), (1,)), ((), ())), preferred_element_type=jnp.float32)
    g2_ref[...] += jax.lax.dot_general(
        x2, x2, (((1,), (1,)), ((), ())), preferred_element_type=jnp.float32)

    @pl.when(k == pl.num_programs(0) - 1)
    def _():
        g1 = g1_ref[...]                   # (B, B) f32
        g2 = g2_ref[...]
        b = g1.shape[0]
        rows = jax.lax.broadcasted_iota(jnp.int32, (b, b), 0)
        cols = jax.lax.broadcasted_iota(jnp.int32, (b, b), 1)
        eye = (rows == cols).astype(jnp.float32)
        # Row L2 norms are sqrt of the Gram diagonals (== torch.norm(dim=1)).
        n1 = jnp.sqrt(jnp.sum(g1 * eye, axis=1, keepdims=True))   # (B, 1)
        n2 = jnp.sqrt(jnp.sum(g2 * eye, axis=1, keepdims=True))   # (B, 1)
        s = (1.0 / (n1 + 1e-6)) * (1.0 / (n2 + 1e-6))             # (B, 1)
        # Transpose of the tiny column vector via a masked reduce (no XLU
        # transpose of an awkward (B,1) shape needed).
        s_t = jnp.sum(eye * s, axis=0, keepdims=True)              # (1, B)
        # sum_{a,b} G1_ab G2_ab s_a s_b  ==  ||d1^T d2||_F^2
        total = jnp.sum(g1 * g2 * s * s_t, keepdims=True)          # (1, 1)
        out_ref[...] = total / jnp.float32(d1 * d2)


def _num_chunks(d1, d2, itemsize, batch, max_block_bytes=4 * 1024 * 1024):
    """Number of grid steps K so the (B, D/K) blocks are lane-aligned and fit VMEM.

    Prefers the smallest K (biggest blocks, least per-step overhead) whose
    blocks fit the per-buffer budget; K > 1 requires both chunk widths to be
    multiples of 128 (lane alignment).  Falls back to K=1 (full-extent blocks,
    always a legal BlockSpec) when no aligned split exists.
    """
    g = math.gcd(d1, d2)
    best = 1
    for k in range(1, g + 1):
        if g % k:
            continue
        td1, td2 = d1 // k, d2 // k
        if k > 1 and (td1 % 128 or td2 % 128):
            continue
        if batch * max(td1, td2) * itemsize <= max_block_bytes:
            return k
        best = k          # keep the largest valid K (smallest blocks) so far
    return best


def diff_loss(input1, input2):
    """Pallas implementation of DiffLoss.forward. Returns a scalar float32."""
    B = input1.shape[0]
    # No wrapper-side astype: pass the native dtype through (bf16 inputs keep
    # half the HBM traffic; accumulation is f32 via preferred_element_type).
    x1 = input1.reshape(B, -1)
    x2 = input2.reshape(B, -1)
    D1 = x1.shape[1]
    D2 = x2.shape[1]

    itemsize = max(jnp.dtype(x1.dtype).itemsize, jnp.dtype(x2.dtype).itemsize)
    K = _num_chunks(D1, D2, itemsize, B)
    td1 = D1 // K
    td2 = D2 // K

    out = pl.pallas_call(
        functools.partial(_diff_loss_kernel, d1=D1, d2=D2),
        out_shape=jax.ShapeDtypeStruct((1, 1), jnp.float32),
        grid=(K,),
        in_specs=[
            pl.BlockSpec((B, td1), lambda k: (0, k)),
            pl.BlockSpec((B, td2), lambda k: (0, k)),
        ],
        out_specs=pl.BlockSpec((1, 1), lambda k: (0, 0)),
        scratch_shapes=[
            pltpu.VMEM((B, B), jnp.float32),   # G1 accumulator
            pltpu.VMEM((B, B), jnp.float32),   # G2 accumulator
        ],
        compiler_params=pltpu.CompilerParams(
            dimension_semantics=("arbitrary",),     # reduction over feature chunks
            vmem_limit_bytes=32 * 1024 * 1024),
    )(x1, x2)

    return out[0, 0]


def _diff_loss_ref(input1, input2):
    """Pure-JAX reference mirroring the PyTorch code."""
    B = input1.shape[0]
    x1 = input1.reshape(B, -1).astype(jnp.float32)
    x2 = input2.reshape(B, -1).astype(jnp.float32)
    n1 = jnp.linalg.norm(x1, axis=1, keepdims=True)
    n2 = jnp.linalg.norm(x2, axis=1, keepdims=True)
    d1 = x1 / (n1 + 1e-6)
    d2 = x2 / (n2 + 1e-6)
    return jnp.mean(jnp.square(d1.T @ d2))


if __name__ == "__main__":
    key = jax.random.PRNGKey(0)
    k1, k2 = jax.random.split(key)
    # DiffLoss is applied to conv feature maps in the original code (NCHW).
    input1 = jax.random.normal(k1, (2, 4, 16, 16), dtype=jnp.float32)
    input2 = jax.random.normal(k2, (2, 4, 16, 16), dtype=jnp.float32)

    loss = jax.block_until_ready(diff_loss(input1, input2))
    ref = jax.block_until_ready(_diff_loss_ref(input1, input2))
    np.testing.assert_allclose(np.asarray(loss), np.asarray(ref),
                               rtol=1e-5, atol=1e-7)
    print("KERNEL_OK")
</pallas_src>

<mosaic_0001>
module attributes {stable_mosaic.version = 11 : i64} {
  func.func @_diff_loss_kernel(%arg0: i32, %arg1: memref<2x1024xf32, #tpu.memory_space<vmem>>, %arg2: memref<2x1024xf32, #tpu.memory_space<vmem>>, %arg3: memref<1x1xf32, #tpu.memory_space<vmem>>, %arg4: memref<2x2xf32, #tpu.memory_space<vmem>>, %arg5: memref<2x2xf32, #tpu.memory_space<vmem>>) attributes {dimension_semantics = [#tpu.dimension_semantics<arbitrary>], iteration_bounds = array<i64: 1>, scalar_prefetch = 0 : i64, scratch_operands = 2 : i64, tpu.core_type = #tpu.core_type<tc>, window_params = [{transform_indices = @transform_0, window_bounds = array<i64: 2, 1024>}, {transform_indices = @transform_1, window_bounds = array<i64: 2, 1024>}, {pipeline_mode = #tpu.pipeline_mode<synchronous>, transform_indices = @transform_2, window_bounds = array<i64: 1, 1>}]} {
    %c0_i32 = arith.constant 0 : i32
    %0 = arith.cmpi eq, %arg0, %c0_i32 : i32
    %1 = arith.extui %0 : i1 to i32
    %c0_i32_0 = arith.constant 0 : i32
    %2 = arith.cmpi ne, %1, %c0_i32_0 : i32
    scf.if %2 {
      %cst_15 = arith.constant 0.000000e+00 : f32
      %16 = vector.broadcast %cst_15 : f32 to vector<2x2xf32>
      %c0_16 = arith.constant 0 : index
      %c0_17 = arith.constant 0 : index
      %17 = vector.load %arg4[%c0_16, %c0_17] : memref<2x2xf32, #tpu.memory_space<vmem>>, vector<2x2xf32>
      tpu.vector_store %arg4[%c0_16, %c0_17], %16 {strides = array<i32>} : memref<2x2xf32, #tpu.memory_space<vmem>>, vector<2x2xf32>,
      %cst_18 = arith.constant 0.000000e+00 : f32
      %18 = vector.broadcast %cst_18 : f32 to vector<2x2xf32>
      %c0_19 = arith.constant 0 : index
      %c0_20 = arith.constant 0 : index
      %19 = vector.load %arg5[%c0_19, %c0_20] : memref<2x2xf32, #tpu.memory_space<vmem>>, vector<2x2xf32>
      tpu.vector_store %arg5[%c0_19, %c0_20], %18 {strides = array<i32>} : memref<2x2xf32, #tpu.memory_space<vmem>>, vector<2x2xf32>,
    } else {
    }
    %c0 = arith.constant 0 : index
    %c0_1 = arith.constant 0 : index
    %3 = vector.load %arg1[%c0, %c0_1] : memref<2x1024xf32, #tpu.memory_space<vmem>>, vector<2x1024xf32>
    %c0_2 = arith.constant 0 : index
    %c0_3 = arith.constant 0 : index
    %4 = vector.load %arg2[%c0_2, %c0_3] : memref<2x1024xf32, #tpu.memory_space<vmem>>, vector<2x1024xf32>
    %c0_4 = arith.constant 0 : index
    %c0_5 = arith.constant 0 : index
    %5 = vector.load %arg4[%c0_4, %c0_5] : memref<2x2xf32, #tpu.memory_space<vmem>>, vector<2x2xf32>
    %cst = arith.constant dense<0.000000e+00> : vector<2x2xf32>
    %6 = tpu.matmul %3, %3, %cst {dimension_numbers = #tpu.dot_dimension_numbers<[1], [1], [0], [0], [0, 0, 1, 0], [], []>} : vector<2x1024xf32>, vector<2x1024xf32>, vector<2x2xf32> -> vector<2x2xf32>
    %7 = arith.addf %5, %6 : vector<2x2xf32>
    %c0_6 = arith.constant 0 : index
    %c0_7 = arith.constant 0 : index
    %8 = vector.load %arg4[%c0_6, %c0_7] : memref<2x2xf32, #tpu.memory_space<vmem>>, vector<2x2xf32>
    tpu.vector_store %arg4[%c0_6, %c0_7], %7 {strides = array<i32>} : memref<2x2xf32, #tpu.memory_space<vmem>>, vector<2x2xf32>,
    %c0_8 = arith.constant 0 : index
    %c0_9 = arith.constant 0 : index
    %9 = vector.load %arg5[%c0_8, %c0_9] : memref<2x2xf32, #tpu.memory_space<vmem>>, vector<2x2xf32>
    %cst_10 = arith.constant dense<0.000000e+00> : vector<2x2xf32>
    %10 = tpu.matmul %4, %4, %cst_10 {dimension_numbers = #tpu.dot_dimension_numbers<[1], [1], [0], [0], [0, 0, 1, 0], [], []>} : vector<2x1024xf32>, vector<2x1024xf32>, vector<2x2xf32> -> vector<2x2xf32>
    %11 = arith.addf %9, %10 : vector<2x2xf32>
    %c0_11 = arith.constant 0 : index
    %c0_12 = arith.constant 0 : index
    %12 = vector.load %arg5[%c0_11, %c0_12] : memref<2x2xf32, #tpu.memory_space<vmem>>, vector<2x2xf32>
    tpu.vector_store %arg5[%c0_11, %c0_12], %11 {strides = array<i32>} : memref<2x2xf32, #tpu.memory_space<vmem>>, vector<2x2xf32>,
    %c0_i32_13 = arith.constant 0 : i32
    %13 = arith.cmpi eq, %arg0, %c0_i32_13 : i32
    %14 = arith.extui %13 : i1 to i32
    %c0_i32_14 = arith.constant 0 : i32
    %15 = arith.cmpi ne, %14, %c0_i32_14 : i32
    scf.if %15 {
      %c0_15 = arith.constant 0 : index
      %c0_16 = arith.constant 0 : index
      %16 = vector.load %arg4[%c0_15, %c0_16] : memref<2x2xf32, #tpu.memory_space<vmem>>, vector<2x2xf32>
      %c0_17 = arith.constant 0 : index
      %c0_18 = arith.constant 0 : index
      %17 = vector.load %arg5[%c0_17, %c0_18] : memref<2x2xf32, #tpu.memory_space<vmem>>, vector<2x2xf32>
      %18 = tpu.iota {dimensions = array<i32: 0>} : vector<2x2xi32>
      %19 = tpu.iota {dimensions = array<i32: 1>} : vector<2x2xi32>
      %20 = arith.cmpi eq, %18, %19 : vector<2x2xi32>
      %21 = arith.extui %20 : vector<2x2xi1> to vector<2x2xi32>
      %22 = arith.sitofp %21 : vector<2x2xi32> to vector<2x2xf32>
      %23 = arith.mulf %16, %22 : vector<2x2xf32>
      %cst_19 = arith.constant dense<0.000000e+00> : vector<2xf32>
      %24 = vector.multi_reduction <add>, %23, %cst_19 [1] : vector<2x2xf32> to vector<2xf32>
      %25 = vector.shape_cast %24 : vector<2xf32> to vector<2x1xf32>
      %26 = math.sqrt %25 : vector<2x1xf32>
      %27 = arith.mulf %17, %22 : vector<2x2xf32>
      %cst_20 = arith.constant dense<0.000000e+00> : vector<2xf32>
      %28 = vector.multi_reduction <add>, %27, %cst_20 [1] : vector<2x2xf32> to vector<2xf32>
      %29 = vector.shape_cast %28 : vector<2xf32> to vector<2x1xf32>
      %30 = math.sqrt %29 : vector<2x1xf32>
      %cst_21 = arith.constant 9.99999997E-7 : f32
      %31 = vector.broadcast %cst_21 : f32 to vector<2x1xf32>
      %32 = arith.addf %26, %31 : vector<2x1xf32>
      %cst_22 = arith.constant 1.000000e+00 : f32
      %33 = vector.broadcast %cst_22 : f32 to vector<2x1xf32>
      %34 = arith.divf %33, %32 : vector<2x1xf32>
      %cst_23 = arith.constant 9.99999997E-7 : f32
      %35 = vector.broadcast %cst_23 : f32 to vector<2x1xf32>
      %36 = arith.addf %30, %35 : vector<2x1xf32>
      %cst_24 = arith.constant 1.000000e+00 : f32
      %37 = vector.broadcast %cst_24 : f32 to vector<2x1xf32>
      %38 = arith.divf %37, %36 : vector<2x1xf32>
      %39 = arith.mulf %34, %38 : vector<2x1xf32>
      %40 = vector.broadcast %39 : vector<2x1xf32> to vector<2x2xf32>
      %41 = arith.mulf %22, %40 : vector<2x2xf32>
      %cst_25 = arith.constant dense<0.000000e+00> : vector<2xf32>
      %42 = vector.multi_reduction <add>, %41, %cst_25 [0] : vector<2x2xf32> to vector<2xf32>
      %43 = vector.shape_cast %42 : vector<2xf32> to vector<1x2xf32>
      %44 = arith.mulf %16, %17 : vector<2x2xf32>
      %45 = vector.broadcast %39 : vector<2x1xf32> to vector<2x2xf32>
      %46 = arith.mulf %44, %45 : vector<2x2xf32>
      %47 = vector.broadcast %43 : vector<1x2xf32> to vector<2x2xf32>
      %48 = arith.mulf %46, %47 : vector<2x2xf32>
      %49 = vector.shape_cast %48 : vector<2x2xf32> to vector<1x2x2xf32>
      %cst_26 = arith.constant dense<0.000000e+00> : vector<1xf32>
      %50 = vector.multi_reduction <add>, %49, %cst_26 [1, 2] : vector<1x2x2xf32> to vector<1xf32>
      %51 = vector.shape_cast %50 : vector<1xf32> to vector<1x1x1xf32>
      %52 = vector.extract %51[0, 0, 0] : f32 from vector<1x1x1xf32>
      %53 = vector.broadcast %52 : f32 to vector<1x1xf32>
      %cst_27 = arith.constant 0x49800000 : f32
      %54 = vector.broadcast %cst_27 : f32 to vector<1x1xf32>
      %55 = arith.divf %53, %54 : vector<1x1xf32>
      %c0_28 = arith.constant 0 : index
      %c0_29 = arith.constant 0 : index
      %56 = vector.load %arg3[%c0_28, %c0_29] : memref<1x1xf32, #tpu.memory_space<vmem>>, vector<1x1xf32>
      tpu.vector_store %arg3[%c0_28, %c0_29], %55 {strides = array<i32>} : memref<1x1xf32, #tpu.memory_space<vmem>>, vector<1x1xf32>,
    } else {
    }
    return
  }
  func.func @transform_0(%arg0: i32) -> (i32, i32) {
    %c0_i32 = arith.constant 0 : i32
    %c0_i32_0 = arith.constant 0 : i32
    return %c0_i32, %arg0 : i32, i32
  }
  func.func @transform_1(%arg0: i32) -> (i32, i32) {
    %c0_i32 = arith.constant 0 : i32
    %c0_i32_0 = arith.constant 0 : i32
    return %c0_i32, %arg0 : i32, i32
  }
  func.func @transform_2(%arg0: i32) -> (i32, i32) {
    %c0_i32 = arith.constant 0 : i32
    %c0_i32_0 = arith.constant 0 : i32
    %c0_i32_1 = arith.constant 0 : i32
    return %c0_i32, %c0_i32_0 : i32, i32
  }
}

</mosaic_0001>

<bundles_post_ra>
// kernel: tpu_custom_call.1
= control target key start
LH: loop header
LB: loop body
LE: loop exit
PB: predicated region body
PF: predicated region fallthrough
CT: control target
= control target key end

     0   :  { %7 = vsyncpa [#allocation5], 0  ;;  %s947_s0 = inlined_call_operand.hbm [shape: f32[2,1024], index: 0, kind: input, shape index: {}]   ;;  %s948_s1 = inlined_call_operand.hbm [shape: f32[2,1024], index: 1, kind: input, shape index: {}]   ;;  %s949_s2 = inlined_call_operand.hbm [shape: f32[1,1], index: 2, kind: output, shape index: {}]  }
   0x1   :  { %8 = vsyncpa [#allocation8], 0 }
   0x2   :  { %9 = vsyncpa [#allocation6], 0  ;;  %s877_s9 = smov [#allocation4]   ;;  %s878_s11 = smov [#allocation7]  }
   0x3   :  { %s16_s10 = sshll.u32 %s877_s9, 4  ;;  %s26_s12 = sshll.u32 %s878_s11, 4  ;;  %s17_s10 = int_to_ptr.vmem [resolvable:$true] %s16_s10  ;;  %s27_s12 = int_to_ptr.vmem [resolvable:$true] %s26_s12 }
   0x4   :  { %s805_s15 = scalar_lea.hbm %s947_s0, 256 }
   0x5   :  { %p806_p0 = scmp.ne.s32.totalorder %s947_s0, %s805_s15  ;;  %p809_p1 = scmp.lt.u32.totalorder %s805_s15, %s947_s0 }
   0x7   :  { %p811_p2 = pnand %p809_p1, %p806_p0 }
   0x9   :  { %814 = shalt.err (!%p811_p2)
}
   0xa   :  { %s815_s20 = scalar_lea.vmem %s17_s10, 256  ;;  %p820_p4 = scmp.lt.s32.totalorder %s17_s10, %s17_s10 }
   0xb   :  { %p816_p3 = scmp.ne.s32.totalorder %s17_s10, %s815_s20  ;;  %p821_p5 = scmp.lt.s32.totalorder %s815_s20, %s815_s20 }
   0xd   :  { %p822_p6 = por %p821_p5, %p820_p4 }
   0xf   :  { %p823_p7 = pnand %p822_p6, %p816_p3 }
  0x11   :  { %826 = shalt.err (!%p823_p7)
}
  0x12   :  { %19 = dma.hbm_to_vmem [thread:$0]  %s947_s0, 256, %s17_s10, [#allocation5]  }
  0x13   :  { %s827_s25 = scalar_lea.hbm %s948_s1, 256 }
  0x14   :  { %p828_p8 = scmp.ne.s32.totalorder %s948_s1, %s827_s25  ;;  %p831_p9 = scmp.lt.u32.totalorder %s827_s25, %s948_s1 }
  0x16   :  { %p833_p10 = pnand %p831_p9, %p828_p8 }
  0x18   :  { %836 = shalt.err (!%p833_p10)
}
  0x19   :  { %s837_s30 = scalar_lea.vmem %s27_s12, 256  ;;  %p842_p12 = scmp.lt.s32.totalorder %s27_s12, %s27_s12 }
  0x1a   :  { %p838_p11 = scmp.ne.s32.totalorder %s27_s12, %s837_s30  ;;  %p843_p13 = scmp.lt.s32.totalorder %s837_s30, %s837_s30 }
  0x1c   :  { %p844_p0 = por %p843_p13, %p842_p12 }
  0x1e   :  { %p845_p1 = pnand %p844_p0, %p838_p11 }
  0x20   :  { %848 = shalt.err (!%p845_p1)
}
  0x21   :  { %29 = dma.hbm_to_vmem [thread:$0]  %s948_s1, 256, %s27_s12, [#allocation8]  }
  0x22   :  { %871 = dma.done.wait [#allocation5], 256  }
  0x23   :  { %872 = vsyncadd [#allocation5], 4294967040 }
  0x24   :  { %873 = dma.done.wait [#allocation8], 256  }
  0x25   :  { %874 = vsyncadd [#allocation8], 4294967040  ;;  %v54_v0 = vlaneseq  ;;  %v879_v1 = vmov 1983009808   ;;  %v43_v6 = vld [vmem:[#allocation4] sm:$0xff]  ;;  %v44_v7 = vld [vmem:[#allocation4 + $0x8] sm:$0xff] }
  0x26   :  { %v52_v2 = vunpack.c.l.s4 %v879_v1  ;;  %v45_v8 = vld [vmem:[#allocation7] sm:$0xff]  ;;  %v50_v10 = vcombine.high %v43_v6, %v43_v6  ;;  %v67_v12 = vcombine.high %v44_v7, %v44_v7  ;;  %v46_v13 = vld [vmem:[#allocation7 + $0x8] sm:$0xff]  ;;  %vm40_vm0 = vcmask 9216   ;;  %s881_s1 = smov [#allocation9]  }
  0x27   :  { %v922_v3 = vshrl.u32 %v54_v0, 7  ;;  %v378_v15 = vcombine.high %v45_v8, %v45_v8  ;;  %v395_v20 = vcombine.high %v46_v13, %v46_v13  ;;  %v880_v30 = vmov 0.0   ;;  %s775_s4 = sshll.u32 %s881_s1, 4  ;;  %s776_s4 = int_to_ptr.vmem [resolvable:$true] %s775_s4 }
  0x28   :  { %v53_v4 = vunpack.c.0.s8 %v52_v2  ;;  %41 = vst.msk [vmem:[#allocation2] sm:$0x3] %vm40_vm0, %v880_v30  ;;  %42 = vst.msk [vmem:[#allocation3] sm:$0x3] %vm40_vm0, %v880_v30  ;;  %v710_v46 = vand.u32 127, %v54_v0  ;;  %vm767_vm6 = vcmask 0   ;;  %p854_p3 = scmp.lt.s32.totalorder %s776_s4, %s776_s4 }
  0x29   :  { %s849_s6 = scalar_lea.vmem %s776_s4, 16  ;;  %s853_s7 = scalar_lea.vmem %s776_s4, 32 }
  0x2a   :  { %v56_v5 = vsub.s32 %v53_v4, %v922_v3  ;;  %vm711_vm1 = vcmp.eq.s32.totalorder %v922_v3, %v710_v46  ;;  %p850_p2 = scmp.ne.s32.totalorder %s776_s4, %s849_s6  ;;  %p855_p4 = scmp.lt.s32.totalorder %s853_s7, %s849_s6 }
  0x2b   :  { %v785_v57 = vsel %vm711_vm1, 1.0, %v880_v30 }
  0x2c   :  { %v57_v9 = vrot.slane %v43_v6, %v56_v5  ;;  %v74_v11 = vrot.slane %v44_v7, %v56_v5  ;;  %v385_v14 = vrot.slane %v45_v8, %v56_v5  ;;  %v64_v17 = vrot.slane %v50_v10, %v56_v5  ;;  %p856_p5 = por %p855_p4, %p854_p3 }
  0x2d   :  { %v81_v19 = vrot.slane %v67_v12, %v56_v5  ;;  %v392_v23 = vrot.slane %v378_v15, %v56_v5  ;;  %v402_v25 = vrot.slane %v46_v13, %v56_v5  ;;  %v409_v27 = vrot.slane %v395_v20, %v56_v5 }
  0x2e   :  { %v65_v16 = vcombine.high %v57_v9, %v57_v9  ;;  %v82_v18 = vcombine.high %v74_v11, %v74_v11  ;;  %v66_v21 = vcombine.high %v64_v17, %v64_v17  ;;  %v393_v24 = vcombine.high %v385_v14, %v385_v14  ;;  %p857_p6 = pnand %p856_p5, %p850_p2 }
  0x2f   :  { %v83_v22 = vcombine.high %v81_v19, %v81_v19  ;;  %v394_v26 = vcombine.high %v392_v23, %v392_v23  ;;  %v410_v28 = vcombine.high %v402_v25, %v402_v25  ;;  %v411_v29 = vcombine.high %v409_v27, %v409_v27  ;;  %v47_v39 = vld [vmem:[#allocation2] sm:$0x3]  ;;  %v375_v53 = vld [vmem:[#allocation3] sm:$0x3] }
  0x30   :  { %92 = vmatprep.subr.mxu0 %v65_v16  ;;  %156 = vmatprep.mubr.f32.mxu0 %v65_v16 }
  0x31   :  { %93 = vmatpush1.xpose.msra.mxu0 %v57_v9  ;;  %162 = vmatprep.subr.mxu1 %v66_v21 }
  0x32   :  { %232 = vmatprep.subr.mxu0 %v82_v18  ;;  %163 = vmatpush1.xpose.msra.mxu1 %v64_v17 }
  0x33   :  { %226 = vmatprep.mubr.f32.mxu1 %v66_v21  ;;  %302 = vmatprep.subr.mxu1 %v83_v22 }
  0x34   :  { %157 = vmatmul.mubr.f32.vlgmr.msra.gmra.mrb[0].mxu0 %v57_v9 }
  0x35   :  { %233 = vmatpush1.xpose.msra.mxu0 %v74_v11  ;;  %296 = vmatprep.mubr.f32.mxu0 %v82_v18 }
  0x36   :  { %227 = vmatmul.mubr.f32.vlgmr.msra.gmra.mrb[0].mxu1 %v64_v17  ;;  %420 = vmatprep.subr.mxu0 %v393_v24 }
  0x37   :  { %303 = vmatpush1.xpose.msra.mxu1 %v81_v19  ;;  %366 = vmatprep.mubr.f32.mxu1 %v83_v22 }
  0x38   :  { %297 = vmatmul.mubr.f32.vlgmr.msra.gmra.mrb[2].mxu0 %v74_v11  ;;  %490 = vmatprep.subr.mxu1 %v394_v26 }
  0x39   :  { %421 = vmatpush1.xpose.msra.mxu0 %v385_v14  ;;  %484 = vmatprep.mubr.f32.mxu0 %v393_v24 }
  0x3a   :  { %367 = vmatmul.mubr.f32.vlgmr.msra.gmra.mrb[2].mxu1 %v81_v19  ;;  %560 = vmatprep.subr.mxu0 %v410_v28 }
  0x3b   :  { %491 = vmatpush1.xpose.msra.mxu1 %v392_v23  ;;  %554 = vmatprep.mubr.f32.mxu1 %v394_v26 }
  0x3c   :  { %485 = vmatmul.mubr.f32.vlgmr.msra.gmra.mrb[4].mxu0 %v385_v14  ;;  %630 = vmatprep.subr.mxu1 %v411_v29 }
  0x3d   :  { %561 = vmatpush1.xpose.msra.mxu0 %v402_v25  ;;  %624 = vmatprep.mubr.f32.mxu0 %v410_v28 }
  0x3e   :  { %555 = vmatmul.mubr.f32.vlgmr.msra.gmra.mrb[4].mxu1 %v392_v23 }
  0x3f   :  { %631 = vmatpush1.xpose.msra.mxu1 %v409_v27  ;;  %694 = vmatprep.mubr.f32.mxu1 %v411_v29 }
  0x40   :  { %625 = vmatmul.mubr.f32.vlgmr.msra.gmra.mrb[6].mxu0 %v402_v25 }
  0x42   :  { %695 = vmatmul.mubr.f32.vlgmr.msra.gmra.mrb[6].mxu1 %v409_v27 }
 0x107   :  { %v158_v31 = vpop.f32.mrb[0].mxu0 }
 0x108   :  { %v160_v32 = vpop.f32.mrb[1].mxu0 }
 0x109   :  { %v228_v33 = vpop.f32.mrb[0].mxu1 }
 0x10a   :  { %v229_v34 = vadd.f32 %v228_v33, %v158_v31  ;;  %v230_v35 = vpop.f32.mrb[1].mxu1 }
 0x10b   :  { %v298_v36 = vpop.f32.mrb[2].mxu0 }
 0x10c   :  { %v299_v37 = vadd.f32 %v298_v36, %v229_v34  ;;  %v300_v38 = vpop.f32.mrb[3].mxu0 }
 0x10d   :  { %v368_v40 = vpop.f32.mrb[2].mxu1 }
 0x10e   :  { %v369_v41 = vadd.f32 %v368_v40, %v299_v37  ;;  %v370_v42 = vpop.f32.mrb[3].mxu1 }
 0x10f   :  { %v486_v43 = vpop.f32.mrb[4].mxu0 }
 0x110   :  { %v372_v44 = vadd.f32 %v369_v41, %v47_v39  ;;  %v488_v45 = vpop.f32.mrb[5].mxu0 }
 0x111   :  { %v556_v47 = vpop.f32.mrb[4].mxu1 }
 0x112   :  { %374 = vst.msk [vmem:[#allocation2] sm:$0x3] %vm40_vm0, %v372_v44  ;;  %v557_v48 = vadd.f32 %v556_v47, %v486_v43  ;;  %v558_v49 = vpop.f32.mrb[5].mxu1 }
 0x113   :  { %v626_v50 = vpop.f32.mrb[6].mxu0 }
 0x114   :  { %v627_v51 = vadd.f32 %v626_v50, %v557_v48  ;;  %v628_v52 = vpop.f32.mrb[7].mxu0 }
 0x115   :  { %v696_v54 = vpop.f32.mrb[6].mxu1 }
 0x116   :  { %v697_v55 = vadd.f32 %v696_v54, %v627_v51  ;;  %v698_v56 = vpop.f32.mrb[7].mxu1 }
 0x118   :  { %v700_v58 = vadd.f32 %v697_v55, %v375_v53 }
 0x119   :  { %v705_v59 = vld [vmem:[#allocation2] sm:$0x3] }
 0x11a   :  { %701 = vst.msk [vmem:[#allocation3] sm:$0x3] %vm40_vm0, %v700_v58  ;;  %v714_v60 = vmul.f32 %v785_v57, %v705_v59 }
 0x11c   :  { %v715_v61 = vsel %vm40_vm0, %v714_v60, 0.0 }
 0x11d   :  { %716 = vadd.xlane.f32.xlu0 %v715_v61 }
 0x121   :  { %v706_v62 = vld [vmem:[#allocation3] sm:$0x3] }
 0x122   :  { %v725_v63 = vmul.f32 %v785_v57, %v706_v62  ;;  %v751_v0 = vmul.f32 %v706_v62, %v705_v59 }
 0x124   :  { %v726_v1 = vsel %vm40_vm0, %v725_v63, 0.0 }
 0x125   :  { %727 = vadd.xlane.f32.xlu0 %v726_v1 }
 0x1aa   :  { %v717_v2 = vpop.xlane.xlu0 %716 }
 0x1ab   :  { %797 = vrsqrt.f32 %v717_v2  ;;  %vm720_vm2 = vcmp.eq.f32.partialorder %v717_v2, inf  ;;  %v723_v7 = vand.u32 2147483648, %v717_v2  ;;  %vm722_vm3 = vcmp.eq.f32.partialorder %v717_v2, 0.0 }
 0x1b2   :  { %v728_v3 = vpop.xlane.xlu0 %727 }
 0x1b3   :  { %799 = vrsqrt.f32 %v728_v3  ;;  %vm731_vm4 = vcmp.eq.f32.partialorder %v728_v3, inf  ;;  %v734_v12 = vand.u32 2147483648, %v728_v3  ;;  %vm733_vm5 = vcmp.eq.f32.partialorder %v728_v3, 0.0 }
 0x1b5   :  { %v798_v4 = vpop.eup %797 }
 0x1b6   :  { %v719_v5 = vmul.f32 %v798_v4, %v717_v2 }
 0x1b8   :  { %v721_v6 = vsel %vm720_vm2, %v717_v2, %v719_v5 }
 0x1b9   :  { %v724_v8 = vsel %vm722_vm3, %v723_v7, %v721_v6 }
 0x1ba   :  { %v736_v11 = vadd.f32 1e-06, %v724_v8 }
 0x1bc   :  { %801 = vrcp.f32 %v736_v11 }
 0x1bd   :  { %v800_v9 = vpop.eup %799 }
 0x1be   :  { %v730_v10 = vmul.f32 %v800_v9, %v728_v3 }
 0x1c0   :  { %v732_v13 = vsel %vm731_vm4, %v728_v3, %v730_v10 }
 0x1c1   :  { %v735_v14 = vsel %vm733_vm5, %v734_v12, %v732_v13 }
 0x1c2   :  { %v739_v15 = vadd.f32 1e-06, %v735_v14 }
 0x1c4   :  { %803 = vrcp.f32 %v739_v15 }
 0x1c6   :  { %v802_v16 = vpop.eup %801 }
 0x1ce   :  { %v804_v17 = vpop.eup %803 }
 0x1cf   :  { %v742_v18 = vmul.f32 %v804_v17, %v802_v16 }
 0x1d1   :  { %v743_v19 = vmul.f32 %v785_v57, %v742_v18  ;;  %v752_v27 = vmul.f32 %v751_v0, %v742_v18 }
 0x1d3   :  { %v744_v20 = vsel %vm40_vm0, %v743_v19, 0.0 }
 0x1d4   :  { %v745_v21 = vrot.slane %v744_v20, 4 }
 0x1d6   :  { %v746_v22 = vadd.f32 %v745_v21, %v744_v20 }
 0x1d8   :  { %v747_v23 = vrot.slane %v746_v22, 2 }
 0x1da   :  { %v748_v24 = vadd.f32 %v747_v23, %v746_v22 }
 0x1dc   :  { %v749_v25 = vrot.slane %v748_v24, 1 }
 0x1de   :  { %v750_v26 = vadd.f32 %v749_v25, %v748_v24 }
 0x1e0   :  { %v753_v28 = vmul.f32 %v752_v27, %v750_v26 }
 0x1e2   :  { %v754_v29 = vsel %vm40_vm0, %v753_v28, 0.0 }
 0x1e3   :  { %755 = vadd.xlane.f32.xlu1 %v754_v29 }
 0x270   :  { %v756_v30 = vpop.xlane.xlu1 %755 }
 0x271   :  { %v757_v31 = vrot.slane %v756_v30, 4 }
 0x273   :  { %v758_v32 = vadd.f32 %v757_v31, %v756_v30 }
 0x275   :  { %v759_v33 = vrot.slane %v758_v32, 2 }
 0x277   :  { %v760_v34 = vadd.f32 %v759_v33, %v758_v32 }
 0x279   :  { %v761_v35 = vrot.slane %v760_v34, 1 }
 0x27b   :  { %v762_v36 = vadd.f32 %v761_v35, %v760_v34 }
 0x27d   :  { %786 = vpush %v762_v36 }
 0x2ae   :  { %s787_s5 = spop %786 }
 0x2af   :  { %v764_v37 = vstv %s787_s5 }
 0x2b0   :  { %v766_v38 = vmul.f32 9.536743e-07, %v764_v37 }
 0x2b2   :  { %768 = vst.msk [vmem:[#allocation9] sm:$0x1] %vm767_vm6, %v766_v38 }
 0x2b3   :  { %860 = shalt.err (!%p857_p6)
}
 0x2b4   :  { %s861_s10 = scalar_lea.hbm %s949_s2, 16 }
 0x2b5   :  { %p862_p7 = scmp.ne.s32.totalorder %s949_s2, %s861_s10  ;;  %p865_p8 = scmp.lt.u32.totalorder %s861_s10, %s949_s2 }
 0x2b7   :  { %p867_p9 = pnand %p865_p8, %p862_p7 }
 0x2b9   :  { %870 = shalt.err (!%p867_p9)
}
 0x2ba   :  { %778 = dma.vmem_to_hbm [thread:$0]  %s776_s4, 16, %s949_s2, [#allocation6]  }
 0x2bb   :  { %875 = dma.done.wait [#allocation6], 16  }
 0x2bc   :  { %876 = vsyncadd [#allocation6], 4294967280 }
 0x2bd   :  { %782 = vsyncpa [#allocation5], 1 }
 0x2be   :  { %783 = vsyncpa [#allocation8], 1 }
 0x2bf   :  { %784 = vsyncpa [#allocation6], 1 }

</bundles_post_ra>
